<compile_context>
chip_gen: v6e
topology: v6e:2x2x1
jax: 0.10.0
libtpu: 0.0.40
codegen_flags: <defaults>
</compile_context>

<pallas_src>
import math

import jax
import jax.numpy as jnp
from jax.experimental import pallas as pl
from jax.experimental.pallas import tpu as pltpu


def _round_up(x: int, m: int) -> int:
    return ((x + m - 1) // m) * m


def _sublane_pack(dtype) -> int:
    # f32 -> 8, bf16 -> 16, int8/fp8 -> 32 (sublane packing of sub-32-bit dtypes).
    bits = jnp.dtype(dtype).itemsize * 8
    return (32 // bits) * 8


def _pick_tile(dim_pad: int, target: int, align: int) -> int:
    """Largest multiple of `align` that divides `dim_pad` and is <= target."""
    target = max(target, align)
    best = align
    t = align
    while t <= min(target, dim_pad):
        if dim_pad % t == 0:
            best = t
        t += align
    return min(best, dim_pad)


def _vmem_budget_bytes() -> int:
    cap = 64 << 20  # safe fallback (v7x physical per-TC VMEM)
    try:
        info = pltpu.get_tpu_info()
        cap = int(getattr(info, "vmem_capacity_bytes", cap) or cap)
    except Exception:
        pass
    return int(cap * 0.85)  # headroom for Mosaic internal scratch


# --------------------------- kernels ---------------------------------------


def _proj_kernel(x_ref, w_ref, b_ref, o_ref):
    # Full-K strip per (i, j) tile: one MXU dot, f32 bias add, downcast store.
    acc = jnp.dot(x_ref[...], w_ref[...], preferred_element_type=jnp.float32)
    o_ref[...] = (acc + b_ref[...].astype(jnp.float32)).astype(o_ref.dtype)


def _proj_kernel_ksplit(x_ref, w_ref, b_ref, o_ref, acc_ref):
    # K-grid path: f32 VMEM accumulator resident across the reduction axis.
    @pl.when(pl.program_id(2) == 0)
    def _():
        acc_ref[...] = jnp.zeros_like(acc_ref)

    acc_ref[...] += jnp.dot(x_ref[...], w_ref[...],
                            preferred_element_type=jnp.float32)

    @pl.when(pl.program_id(2) == pl.num_programs(2) - 1)
    def _():
        o_ref[...] = (acc_ref[...] + b_ref[...].astype(jnp.float32)).astype(
            o_ref.dtype)


# --------------------------- wrapper ----------------------------------------


def prepare_projection_params(torch_weight, torch_bias,
                              compute_dtype=jnp.bfloat16):
    """One-time (load-time) prep: PyTorch (vocab, d_model) weight ->
    (d_model, vocab) in the MXU streaming dtype, bias in f32.  Doing this
    outside the hot path avoids re-casting/padding a multi-GiB weight per call."""
    w = jnp.asarray(torch_weight).T.astype(compute_dtype)
    b = jnp.asarray(torch_bias).astype(jnp.float32)
    return w, b


def projection_layer(x, weight, bias, *,
                     tm=512, tn=1024, tk=1024,
                     compute_dtype=jnp.bfloat16, out_dtype=None):
    """x: (..., d_model); weight: (d_model, vocab) (transpose of PyTorch's
    (vocab, d_model)); bias: (vocab,).  Returns (..., vocab) in `out_dtype`
    (defaults to x.dtype, matching the f32 module up to bf16 MXU rounding)."""
    *lead, K = x.shape
    Kw, N = weight.shape
    assert K == Kw and bias.shape == (N,)
    M = max(1, math.prod(lead))
    out_dtype = x.dtype if out_dtype is None else out_dtype

    cb = jnp.dtype(compute_dtype).itemsize
    ob = jnp.dtype(out_dtype).itemsize
    pack = _sublane_pack(compute_dtype)

    # --- tile selection: divisors of the minimally padded dims --------------
    M_pad = _round_up(M, pack)
    N_pad = _round_up(N, 128)
    tm = _pick_tile(M_pad, tm, pack)
    tn = _pick_tile(N_pad, tn, 128)

    budget = _vmem_budget_bytes()

    # Full-K strips (no reduction grid axis) if the double-buffered working
    # set fits the per-generation VMEM budget.
    fullk_bytes = (2 * (tm * K + K * tn) * cb      # x / w strips, double-buffered
                   + 2 * tm * tn * ob              # output tile, double-buffered
                   + tm * tn * 4                   # f32 dot intermediate
                   + 2 * 8 * tn * 4)               # bias block (sublane-padded)
    split_k = fullk_bytes > budget - (4 << 20)
    if not split_k:
        tk = K
        K_pad = K
    else:
        tk = _pick_tile(_round_up(K, 128), tk, 128)
        K_pad = _round_up(K, tk)

    # --- minimal padding (no-op in the common 128-aligned case) -------------
    x2d = x.reshape(M, K).astype(compute_dtype)
    if (M_pad, K_pad) != (M, K):
        x2d = jnp.pad(x2d, ((0, M_pad - M), (0, K_pad - K)))
    w = weight.astype(compute_dtype)  # no-op if prepared at load time
    if (K_pad, N_pad) != (K, N):
        # Rare (d_model / vocab not 128-aligned); materializes a weight copy.
        w = jnp.pad(w, ((0, K_pad - K), (0, N_pad - N)))
    b2d = bias.reshape(1, N).astype(jnp.float32)
    if N_pad != N:
        b2d = jnp.pad(b2d, ((0, 0), (0, N_pad - N)))

    gm, gn, gk = M_pad // tm, N_pad // tn, K_pad // tk

    # --- cost estimate: weight streamed gm times; x once (full-K) / gn times
    x_reads = gn if split_k else 1
    cost = pl.CostEstimate(
        flops=2 * M_pad * N_pad * K_pad,
        transcendentals=0,
        bytes_accessed=(x_reads * M_pad * K_pad * cb
                        + gm * K_pad * N_pad * cb
                        + M_pad * N_pad * ob
                        + N_pad * 4),
    )

    if not split_k:
        kernel = _proj_kernel
        grid_spec = pltpu.PrefetchScalarGridSpec(
            num_scalar_prefetch=0,
            grid=(gm, gn),
            in_specs=[
                pl.BlockSpec((tm, K), lambda i, j: (i, 0)),   # x strip
                pl.BlockSpec((K, tn), lambda i, j: (0, j)),   # weight strip
                pl.BlockSpec((1, tn), lambda i, j: (0, j)),   # bias tile
            ],
            out_specs=pl.BlockSpec((tm, tn), lambda i, j: (i, j)),
        )
        semantics = ("parallel", "parallel")
    else:
        kernel = _proj_kernel_ksplit
        grid_spec = pltpu.PrefetchScalarGridSpec(
            num_scalar_prefetch=0,
            grid=(gm, gn, gk),
            in_specs=[
                pl.BlockSpec((tm, tk), lambda i, j, k: (i, k)),
                pl.BlockSpec((tk, tn), lambda i, j, k: (k, j)),
                pl.BlockSpec((1, tn), lambda i, j, k: (0, j)),
            ],
            out_specs=pl.BlockSpec((tm, tn), lambda i, j, k: (i, j)),
            scratch_shapes=[pltpu.VMEM((tm, tn), jnp.float32)],
        )
        semantics = ("parallel", "parallel", "arbitrary")

    out2d = pl.pallas_call(
        kernel,
        out_shape=jax.ShapeDtypeStruct((M_pad, N_pad), out_dtype),
        grid_spec=grid_spec,
        compiler_params=pltpu.CompilerParams(
            dimension_semantics=semantics,
            vmem_limit_bytes=budget,
        ),
        cost_estimate=cost,
    )(x2d, w, b2d)

    if (M_pad, N_pad) != (M, N):
        out2d = out2d[:M, :N]
    return out2d.reshape(*lead, N)


# --------------------------- demo / check -----------------------------------

if __name__ == "__main__":
    batch, seq, d_model, vocab_size = 2, 8, 32, 128

    key = jax.random.PRNGKey(0)
    kx, kw, kb = jax.random.split(key, 3)

    x = jax.random.normal(kx, (batch, seq, d_model), dtype=jnp.float32)

    # nn.Linear default init: weight/bias ~ U(-1/sqrt(d_model), 1/sqrt(d_model)),
    # weight in PyTorch layout (vocab, d_model).
    bound = 1.0 / math.sqrt(d_model)
    w_torch = jax.random.uniform(kw, (vocab_size, d_model),
                                 minval=-bound, maxval=bound,
                                 dtype=jnp.float32)
    b_torch = jax.random.uniform(kb, (vocab_size,),
                                 minval=-bound, maxval=bound,
                                 dtype=jnp.float32)

    # One-time parameter prep (transpose + bf16 cast) outside the hot path.
    weight, bias = prepare_projection_params(w_torch, b_torch)

    out = projection_layer(x, weight, bias)
    jax.block_until_ready(out)

    # Reference: f32 nn.Linear forward. bf16 MXU streaming -> loose tolerance.
    ref = jnp.einsum("bsd,vd->bsv", x, w_torch) + b_torch
    assert out.shape == (batch, seq, vocab_size)
    assert out.dtype == x.dtype
    assert jnp.allclose(out, ref, atol=5e-2, rtol=5e-2)

    print("KERNEL_OK")
</pallas_src>

<mosaic_0001>
module attributes {stable_mosaic.version = 11 : i64} {
  func.func @_proj_kernel(%arg0: i32, %arg1: i32, %arg2: memref<16x32xbf16, #tpu.memory_space<vmem>>, %arg3: memref<32x128xbf16, #tpu.memory_space<vmem>>, %arg4: memref<1x128xf32, #tpu.memory_space<vmem>>, %arg5: memref<16x128xf32, #tpu.memory_space<vmem>>) attributes {dimension_semantics = [#tpu.dimension_semantics<parallel>, #tpu.dimension_semantics<parallel>], iteration_bounds = array<i64: 1, 1>, scalar_prefetch = 0 : i64, scratch_operands = 0 : i64, tpu.core_type = #tpu.core_type<tc>, window_params = [{transform_indices = @transform_0, window_bounds = array<i64: 16, 32>}, {transform_indices = @transform_1, window_bounds = array<i64: 32, 128>}, {transform_indices = @transform_2, window_bounds = array<i64: 1, 128>}, {transform_indices = @transform_3, window_bounds = array<i64: 16, 128>}]} {
    %c0 = arith.constant 0 : index
    %c0_0 = arith.constant 0 : index
    %0 = vector.load %arg2[%c0, %c0_0] : memref<16x32xbf16, #tpu.memory_space<vmem>>, vector<16x32xbf16>
    %c0_1 = arith.constant 0 : index
    %c0_2 = arith.constant 0 : index
    %1 = vector.load %arg3[%c0_1, %c0_2] : memref<32x128xbf16, #tpu.memory_space<vmem>>, vector<32x128xbf16>
    %cst = arith.constant dense<0.000000e+00> : vector<16x128xf32>
    %2 = tpu.matmul %0, %1, %cst {dimension_numbers = #tpu.dot_dimension_numbers<[1], [0], [0], [1], [0, 0, 1, 1], [], []>} : vector<16x32xbf16>, vector<32x128xbf16>, vector<16x128xf32> -> vector<16x128xf32>
    %c0_3 = arith.constant 0 : index
    %c0_4 = arith.constant 0 : index
    %3 = vector.load %arg4[%c0_3, %c0_4] : memref<1x128xf32, #tpu.memory_space<vmem>>, vector<1x128xf32>
    %4 = vector.broadcast %3 : vector<1x128xf32> to vector<16x128xf32>
    %5 = arith.addf %2, %4 : vector<16x128xf32>
    %c0_5 = arith.constant 0 : index
    %c0_6 = arith.constant 0 : index
    %6 = vector.load %arg5[%c0_5, %c0_6] : memref<16x128xf32, #tpu.memory_space<vmem>>, vector<16x128xf32>
    tpu.vector_store %arg5[%c0_5, %c0_6], %5 {strides = array<i32>} : memref<16x128xf32, #tpu.memory_space<vmem>>, vector<16x128xf32>,
    return
  }
  func.func @transform_0(%arg0: i32, %arg1: i32) -> (i32, i32) {
    %c0_i32 = arith.constant 0 : i32
    %c0_i32_0 = arith.constant 0 : i32
    return %arg0, %c0_i32 : i32, i32
  }
  func.func @transform_1(%arg0: i32, %arg1: i32) -> (i32, i32) {
    %c0_i32 = arith.constant 0 : i32
    %c0_i32_0 = arith.constant 0 : i32
    return %c0_i32, %arg1 : i32, i32
  }
  func.func @transform_2(%arg0: i32, %arg1: i32) -> (i32, i32) {
    %c0_i32 = arith.constant 0 : i32
    %c0_i32_0 = arith.constant 0 : i32
    return %c0_i32, %arg1 : i32, i32
  }
  func.func @transform_3(%arg0: i32, %arg1: i32) -> (i32, i32) {
    %c0_i32 = arith.constant 0 : i32
    return %arg0, %arg1 : i32, i32
  }
}

</mosaic_0001>

<bundles_post_ra>
// kernel: tpu_custom_call.1
= control target key start
LH: loop header
LB: loop body
LE: loop exit
PB: predicated region body
PF: predicated region fallthrough
CT: control target
= control target key end

     0   :  { %8 = vsyncpa [#allocation3], 0  ;;  %s274_s0 = inlined_call_operand.hbm [shape: bf16[16,32], index: 0, kind: input, shape index: {}]   ;;  %s275_s1 = inlined_call_operand.hbm [shape: bf16[32,128], index: 1, kind: input, shape index: {}]   ;;  %s276_s2 = inlined_call_operand.vmem [shape: f32[1,128], index: 2, kind: input, shape index: {}]   ;;  %s277_s3 = inlined_call_operand.hbm [shape: f32[16,128], index: 3, kind: output, shape index: {}]  }
   0x1   :  { %9 = vsyncpa [#allocation6], 0 }
   0x2   :  { %10 = vsyncpa [#allocation4], 0  ;;  %s233_s12 = smov [#allocation2]  }
   0x3   :  { %s16_s13 = sshll.u32 %s233_s12, 4  ;;  %s17_s13 = int_to_ptr.vmem [resolvable:$true] %s16_s13 }
   0x4   :  { %s175_s14 = scalar_lea.vmem %s17_s13, 128  ;;  %p180_p1 = scmp.lt.s32.totalorder %s17_s13, %s17_s13 }
   0x5   :  { %p176_p0 = scmp.ne.s32.totalorder %s17_s13, %s175_s14  ;;  %p181_p2 = scmp.lt.s32.totalorder %s175_s14, %s175_s14 }
   0x7   :  { %p182_p3 = por %p181_p2, %p180_p1 }
   0x9   :  { %p183_p4 = pnand %p182_p3, %p176_p0 }
   0xb   :  { %186 = shalt.err (!%p183_p4)
}
   0xc   :  { %s234_s15 = smov 64   ;;  %s235_s16 = smov 4  }
   0xd   :  { %22 = dma.hbm_to_vmem [thread:$0]  %s274_s0, 128, %s17_s13, [#allocation3], %s234_s15, %s234_s15, %s235_s16  }
   0xe   :  { %s236_s19 = smov [#allocation5]  }
   0xf   :  { %s28_s20 = sshll.u32 %s236_s19, 4  ;;  %s29_s20 = int_to_ptr.vmem [resolvable:$true] %s28_s20 }
  0x10   :  { %s195_s21 = scalar_lea.vmem %s29_s20, 256  ;;  %p200_p6 = scmp.lt.s32.totalorder %s29_s20, %s29_s20 }
  0x11   :  { %p196_p5 = scmp.ne.s32.totalorder %s29_s20, %s195_s21  ;;  %p201_p7 = scmp.lt.s32.totalorder %s195_s21, %s195_s21 }
  0x13   :  { %p202_p8 = por %p201_p7, %p200_p6 }
  0x15   :  { %p203_p9 = pnand %p202_p8, %p196_p5 }
  0x17   :  { %206 = shalt.err (!%p203_p9)
}
  0x18   :  { %34 = dma.hbm_to_vmem [thread:$0]  %s275_s1, 256, %s29_s20, [#allocation6], %s234_s15, %s234_s15, %s235_s16  }
  0x19   :  { %227 = dma.done.wait [#allocation3], 128  }
  0x1a   :  { %228 = vsyncadd [#allocation3], 4294967168 }
  0x1b   :  { %229 = dma.done.wait [#allocation6], 256  }
  0x1c   :  { %230 = vsyncadd [#allocation6], 4294967040  ;;  %v237_v0 = vmov 0.0   ;;  %vm238_vm0 = vmmov 0   ;;  %v164_v1 = vld [vmem:[#allocation5 + $0x8] sm:$0xff]   ;;  %v165_v2 = vld [vmem:[#allocation5] sm:$0xff]  }
  0x1d   :  { %147 = vmatprep.subr.bf16.mxu0 %v237_v0  ;;  %151 = vmatprep.mubr.msk.bf16.mxu0 %vm238_vm0, %v237_v0  ;;  %v166_v3 = vld [vmem:[#allocation2] sm:$0xff]   ;;  %vm74_vm1 = vcmask 261120   ;;  %s239_s1 = smov [#allocation7]  }
  0x1e   :  { %148 = vmatpush3.bf16.msra.mxu0 %v164_v1  ;;  %v139_v4 = vld [vmem:[%s276_s2] ss:$0 sm:$0xff]  ;;  %s126_s25 = sshll.u32 %s239_s1, 4  ;;  %s127_s25 = int_to_ptr.vmem [resolvable:$true] %s126_s25 }
  0x1f   :  { %149 = vmatprep.subr.bf16.mxu0 %v237_v0  ;;  %s207_s26 = scalar_lea.vmem %s127_s25, 256  ;;  %p212_p11 = scmp.lt.s32.totalorder %s127_s25, %s127_s25 }
  0x20   :  { %p208_p10 = scmp.ne.s32.totalorder %s127_s25, %s207_s26  ;;  %p213_p12 = scmp.lt.s32.totalorder %s207_s26, %s207_s26 }
  0x22   :  { %150 = vmatpush3.bf16.msra.mxu0 %v165_v2  ;;  %p214_p13 = por %p213_p12, %p212_p11 }
  0x24   :  { %p215_p0 = pnand %p214_p13, %p208_p10 }
  0x25   :  { %152 = vmatmul.mubr.msk.bf16.vlgmr.msra.gmra.mxu0 %vm74_vm1, %v166_v3 }
  0xe5   :  { %v112_v5 = vpop.f32.mrf.mxu0 }
  0xe6   :  { %v113_v6 = vadd.f32 %v139_v4, %v112_v5 }
  0xe7   :  { %v153_v7 = vpop.f32.mrf.mxu0 }
  0xe8   :  { %119 = vst [vmem:[#allocation7] sm:$0xff] %v113_v6 }
  0xe9   :  { %v115_v8 = vpop.f32.mrf.mxu0 }
  0xea   :  { %v116_v9 = vadd.f32 %v139_v4, %v115_v8 }
  0xeb   :  { %v154_v10 = vpop.f32.mrf.mxu0 }
  0xec   :  { %120 = vst [vmem:[#allocation7 + $0x8] sm:$0xff] %v116_v9 }
  0xed   :  { %218 = shalt.err (!%p215_p0)
}
  0xee   :  { %s240_s27 = smov 128   ;;  %s241_s2 = smov 8  }
  0xef   :  { %132 = dma.vmem_to_hbm [thread:$0]  %s127_s25, 256, %s277_s3, [#allocation4], %s240_s27, %s240_s27, %s241_s2  }
  0xf0   :  { %231 = dma.done.wait [#allocation4], 256  }
  0xf1   :  { %232 = vsyncadd [#allocation4], 4294967040 }
  0xf2   :  { %136 = vsyncpa [#allocation3], 1 }
  0xf3   :  { %137 = vsyncpa [#allocation6], 1 }
  0xf4   :  { %138 = vsyncpa [#allocation4], 1 }

</bundles_post_ra>
